<compile_context>
chip_gen: v5e
topology: v5e:2x2
jax: 0.10.0
libtpu: 0.0.40
codegen_flags: <defaults>
</compile_context>

<pallas_src>
import jax
import jax.numpy as jnp
from jax.experimental import pallas as pl
from jax.experimental.pallas import tpu as pltpu


LEAKY_SLOPE = 0.2  # matches the module's default leaky_relu_slope=0.2


def _round_up(x, m):
    return ((x + m - 1) // m) * m


def _leaky_relu(x, slope):
    # valid for 0 < slope < 1: max(x, slope*x) == leaky_relu(x)
    return jnp.maximum(x, slope * x)


def label_prior_kernel(u_ref,
                       w1_ref, b1_ref,
                       w2_ref, b2_ref,
                       wm_ref, bm_ref,
                       wv_ref, bv_ref,
                       mean_ref, log_var_ref):
    # u_ref: (TB, dim_u) f32 tile of the batch; cast to bf16 for the MXU here
    # (no wrapper-side pad/cast pass over u).
    u = u_ref[...].astype(jnp.bfloat16)

    # Layer 1: Linear(dim_u -> hidden_p) + LeakyReLU (f32 accumulate).
    h = jnp.dot(u, w1_ref[...], preferred_element_type=jnp.float32) + b1_ref[...]
    h = _leaky_relu(h, LEAKY_SLOPE).astype(jnp.bfloat16)

    # Layer 2: Linear(hidden_p -> hidden_p) + LeakyReLU.
    h = jnp.dot(h, w2_ref[...], preferred_element_type=jnp.float32) + b2_ref[...]
    h = _leaky_relu(h, LEAKY_SLOPE).astype(jnp.bfloat16)

    # Heads: two exact-width (dim_z) outputs — no padded lanes written to HBM,
    # no post-call slicing needed.
    mean_ref[...] = (jnp.dot(h, wm_ref[...], preferred_element_type=jnp.float32)
                     + bm_ref[...]).astype(mean_ref.dtype)
    log_var_ref[...] = (jnp.dot(h, wv_ref[...], preferred_element_type=jnp.float32)
                        + bv_ref[...]).astype(log_var_ref.dtype)


def prepare_label_prior_params(p):
    """One-time weight preparation (hoisted out of the forward pass).

    Input params (all f32, weights stored as (in, out) = W_pt.T):
      w1 (dim_u, hidden), b1 (1, hidden), w2 (hidden, hidden), b2 (1, hidden),
      wm (hidden, dim_z), bm (1, dim_z), wv (hidden, dim_z), bv (1, dim_z).

    Returns bf16 weights / f32 biases with the hidden dim zero-padded to a
    multiple of 128 (lane-dense intermediates).  Padded columns of w1/b1 give
    h == 0 there (LeakyReLU(0) == 0) and padded rows of w2/wm/wv are zero, so
    the real outputs are exact.
    """
    f32, bf16 = jnp.float32, jnp.bfloat16
    dim_u, hidden = p["w1"].shape
    dim_z = p["wm"].shape[1]
    dh_p = _round_up(hidden, 128)

    def pad2(a, rows, cols, dtype):
        out = jnp.zeros((rows, cols), dtype)
        return out.at[:a.shape[0], :a.shape[1]].set(a.astype(dtype))

    return dict(
        w1=pad2(p["w1"], dim_u, dh_p, bf16),
        b1=pad2(p["b1"], 1, dh_p, f32),
        w2=pad2(p["w2"], dh_p, dh_p, bf16),
        b2=pad2(p["b2"], 1, dh_p, f32),
        wm=pad2(p["wm"], dh_p, dim_z, bf16),
        bm=p["bm"].astype(f32),
        wv=pad2(p["wv"], dh_p, dim_z, bf16),
        bv=p["bv"].astype(f32),
    )


def label_prior_forward(u, prepared, *, block_batch=512):
    """u: (B, dim_u) float32. prepared: output of prepare_label_prior_params.
    Returns (mean, log_var), each (B, dim_z) float32."""
    B, dim_u = u.shape
    dh_p = prepared["w1"].shape[1]
    dim_z = prepared["wm"].shape[1]
    f32 = jnp.float32

    # Batch tiling: sublane-aligned tile; aim for >= 4 grid steps (when B
    # allows) so the batch-parallel axis can shard across TensorCores (v7x).
    block_batch = max(8, _round_up(block_batch, 8))
    TB = max(8, min(block_batch, _round_up(pl.cdiv(B, 4), 8)))
    grid = (pl.cdiv(B, TB),)

    # Explicit VMEM budget (double-buffered u + 2 outputs, weights, live
    # intermediates); raise above v5e's 16 MiB scoped default, stay well under
    # half of v7x's 64 MiB physical VMEM.
    w_bytes = sum(int(prepared[k].size) * prepared[k].dtype.itemsize
                  for k in ("w1", "b1", "w2", "b2", "wm", "bm", "wv", "bv"))
    vmem_est = (2 * TB * dim_u * 4          # u, double-buffered, f32
                + 2 * 2 * TB * dim_z * 4    # mean/log_var, double-buffered, f32
                + 2 * w_bytes               # weights/biases (<=2 buffers)
                + 3 * TB * dh_p * 4)        # live f32/bf16 intermediates
    vmem_limit = int(min(32 * 1024 * 1024, max(16 * 1024 * 1024, 2 * vmem_est)))

    def batch_spec(cols):
        return pl.BlockSpec((TB, cols), lambda i: (i, 0))

    def const_spec(a):
        # Full-array block with a constant index_map: fetched once, not
        # re-DMA'd per grid step.
        return pl.BlockSpec(a.shape, lambda i: (0, 0))

    mean, log_var = pl.pallas_call(
        label_prior_kernel,
        out_shape=(jax.ShapeDtypeStruct((B, dim_z), f32),
                   jax.ShapeDtypeStruct((B, dim_z), f32)),
        grid=grid,
        in_specs=[batch_spec(dim_u),
                  const_spec(prepared["w1"]), const_spec(prepared["b1"]),
                  const_spec(prepared["w2"]), const_spec(prepared["b2"]),
                  const_spec(prepared["wm"]), const_spec(prepared["bm"]),
                  const_spec(prepared["wv"]), const_spec(prepared["bv"])],
        out_specs=(batch_spec(dim_z), batch_spec(dim_z)),
        compiler_params=pltpu.CompilerParams(
            dimension_semantics=("parallel",),
            vmem_limit_bytes=vmem_limit),
    )(u,
      prepared["w1"], prepared["b1"],
      prepared["w2"], prepared["b2"],
      prepared["wm"], prepared["bm"],
      prepared["wv"], prepared["bv"])

    return mean, log_var


def init_label_prior_params(key, dim_u, dim_z, hidden_nodes):
    """Deterministic synthetic init (PyTorch-Linear-like uniform bounds)."""
    ks = jax.random.split(key, 8)

    def lin(kw, kb, fan_in, fan_out):
        bound = 1.0 / jnp.sqrt(fan_in)
        # stored as (in, out) = W_pt.T so kernels compute x @ W + b
        w = jax.random.uniform(kw, (fan_in, fan_out), jnp.float32, -bound, bound)
        b = jax.random.uniform(kb, (1, fan_out), jnp.float32, -bound, bound)
        return w, b

    w1, b1 = lin(ks[0], ks[1], dim_u, hidden_nodes)
    w2, b2 = lin(ks[2], ks[3], hidden_nodes, hidden_nodes)
    wm, bm = lin(ks[4], ks[5], hidden_nodes, dim_z)
    wv, bv = lin(ks[6], ks[7], hidden_nodes, dim_z)
    return dict(w1=w1, b1=b1, w2=w2, b2=b2, wm=wm, bm=bm, wv=wv, bv=bv)


def label_prior_ref(u, p):
    """Pure-JAX f32 reference of the PyTorch forward, for verification."""
    h = u @ p["w1"] + p["b1"]
    h = jnp.where(h > 0, h, LEAKY_SLOPE * h)
    h = h @ p["w2"] + p["b2"]
    h = jnp.where(h > 0, h, LEAKY_SLOPE * h)
    return h @ p["wm"] + p["bm"], h @ p["wv"] + p["bv"]


if __name__ == "__main__":
    # Small shapes consistent with the module's forward: u_input is (B, dim_u).
    B, dim_u, dim_z, hidden = 8, 16, 8, 32

    key = jax.random.PRNGKey(0)
    k_u, k_p = jax.random.split(key)
    u = jax.random.normal(k_u, (B, dim_u), dtype=jnp.float32)
    params = init_label_prior_params(k_p, dim_u, dim_z, hidden)

    # One-time (per model) weight preparation, hoisted out of the forward.
    prepared = prepare_label_prior_params(params)
    jax.block_until_ready(prepared)

    mean, log_var = label_prior_forward(u, prepared)
    jax.block_until_ready((mean, log_var))

    ref_mean, ref_log_var = label_prior_ref(u, params)
    assert mean.shape == (B, dim_z) and log_var.shape == (B, dim_z)
    # bf16 matmul inputs with f32 accumulation -> relaxed tolerance vs f32 ref.
    # (Documented: if log_var feeds exp() downstream, this ~1e-2 rel error is
    # amplified; raise precision there if needed.)
    assert jnp.allclose(mean, ref_mean, atol=3e-2, rtol=3e-2)
    assert jnp.allclose(log_var, ref_log_var, atol=3e-2, rtol=3e-2)

    print("KERNEL_OK")
</pallas_src>

<mosaic_0001>
module attributes {stable_mosaic.version = 11 : i64} {
  func.func @label_prior_kernel(%arg0: i32, %arg1: memref<8x16xf32, #tpu.memory_space<vmem>>, %arg2: memref<16x128xbf16, #tpu.memory_space<vmem>>, %arg3: memref<1x128xf32, #tpu.memory_space<vmem>>, %arg4: memref<128x128xbf16, #tpu.memory_space<vmem>>, %arg5: memref<1x128xf32, #tpu.memory_space<vmem>>, %arg6: memref<128x8xbf16, #tpu.memory_space<vmem>>, %arg7: memref<1x8xf32, #tpu.memory_space<vmem>>, %arg8: memref<128x8xbf16, #tpu.memory_space<vmem>>, %arg9: memref<1x8xf32, #tpu.memory_space<vmem>>, %arg10: memref<8x8xf32, #tpu.memory_space<vmem>>, %arg11: memref<8x8xf32, #tpu.memory_space<vmem>>) attributes {dimension_semantics = [#tpu.dimension_semantics<parallel>], iteration_bounds = array<i64: 1>, scalar_prefetch = 0 : i64, scratch_operands = 0 : i64, tpu.core_type = #tpu.core_type<tc>, window_params = [{transform_indices = @transform_0, window_bounds = array<i64: 8, 16>}, {pipeline_mode = #tpu.pipeline_mode<synchronous>, transform_indices = @transform_1, window_bounds = array<i64: 16, 128>}, {pipeline_mode = #tpu.pipeline_mode<synchronous>, transform_indices = @transform_2, window_bounds = array<i64: 1, 128>}, {pipeline_mode = #tpu.pipeline_mode<synchronous>, transform_indices = @transform_3, window_bounds = array<i64: 128, 128>}, {pipeline_mode = #tpu.pipeline_mode<synchronous>, transform_indices = @transform_4, window_bounds = array<i64: 1, 128>}, {pipeline_mode = #tpu.pipeline_mode<synchronous>, transform_indices = @transform_5, window_bounds = array<i64: 128, 8>}, {pipeline_mode = #tpu.pipeline_mode<synchronous>, transform_indices = @transform_6, window_bounds = array<i64: 1, 8>}, {pipeline_mode = #tpu.pipeline_mode<synchronous>, transform_indices = @transform_7, window_bounds = array<i64: 128, 8>}, {pipeline_mode = #tpu.pipeline_mode<synchronous>, transform_indices = @transform_8, window_bounds = array<i64: 1, 8>}, {transform_indices = @transform_9, window_bounds = array<i64: 8, 8>}, {transform_indices = @transform_10, window_bounds = array<i64: 8, 8>}]} {
    %c0 = arith.constant 0 : index
    %c0_0 = arith.constant 0 : index
    %0 = vector.load %arg1[%c0, %c0_0] : memref<8x16xf32, #tpu.memory_space<vmem>>, vector<8x16xf32>
    %1 = arith.truncf %0 : vector<8x16xf32> to vector<8x16xbf16>
    %c0_1 = arith.constant 0 : index
    %c0_2 = arith.constant 0 : index
    %2 = vector.load %arg2[%c0_1, %c0_2] : memref<16x128xbf16, #tpu.memory_space<vmem>>, vector<16x128xbf16>
    %cst = arith.constant dense<0.000000e+00> : vector<8x128xf32>
    %3 = tpu.matmul %1, %2, %cst {dimension_numbers = #tpu.dot_dimension_numbers<[1], [0], [0], [1], [0, 0, 1, 1], [], []>} : vector<8x16xbf16>, vector<16x128xbf16>, vector<8x128xf32> -> vector<8x128xf32>
    %c0_3 = arith.constant 0 : index
    %c0_4 = arith.constant 0 : index
    %4 = vector.load %arg3[%c0_3, %c0_4] : memref<1x128xf32, #tpu.memory_space<vmem>>, vector<1x128xf32>
    %5 = vector.broadcast %4 : vector<1x128xf32> to vector<8x128xf32>
    %6 = arith.addf %3, %5 : vector<8x128xf32>
    %cst_5 = arith.constant 2.000000e-01 : f32
    %7 = vector.broadcast %cst_5 : f32 to vector<8x128xf32>
    %8 = arith.mulf %7, %6 : vector<8x128xf32>
    %9 = arith.maximumf %6, %8 : vector<8x128xf32>
    %10 = arith.truncf %9 : vector<8x128xf32> to vector<8x128xbf16>
    %c0_6 = arith.constant 0 : index
    %c0_7 = arith.constant 0 : index
    %11 = vector.load %arg4[%c0_6, %c0_7] : memref<128x128xbf16, #tpu.memory_space<vmem>>, vector<128x128xbf16>
    %cst_8 = arith.constant dense<0.000000e+00> : vector<8x128xf32>
    %12 = tpu.matmul %10, %11, %cst_8 {dimension_numbers = #tpu.dot_dimension_numbers<[1], [0], [0], [1], [0, 0, 1, 1], [], []>} : vector<8x128xbf16>, vector<128x128xbf16>, vector<8x128xf32> -> vector<8x128xf32>
    %c0_9 = arith.constant 0 : index
    %c0_10 = arith.constant 0 : index
    %13 = vector.load %arg5[%c0_9, %c0_10] : memref<1x128xf32, #tpu.memory_space<vmem>>, vector<1x128xf32>
    %14 = vector.broadcast %13 : vector<1x128xf32> to vector<8x128xf32>
    %15 = arith.addf %12, %14 : vector<8x128xf32>
    %cst_11 = arith.constant 2.000000e-01 : f32
    %16 = vector.broadcast %cst_11 : f32 to vector<8x128xf32>
    %17 = arith.mulf %16, %15 : vector<8x128xf32>
    %18 = arith.maximumf %15, %17 : vector<8x128xf32>
    %19 = arith.truncf %18 : vector<8x128xf32> to vector<8x128xbf16>
    %c0_12 = arith.constant 0 : index
    %c0_13 = arith.constant 0 : index
    %20 = vector.load %arg6[%c0_12, %c0_13] : memref<128x8xbf16, #tpu.memory_space<vmem>>, vector<128x8xbf16>
    %cst_14 = arith.constant dense<0.000000e+00> : vector<8x8xf32>
    %21 = tpu.matmul %19, %20, %cst_14 {dimension_numbers = #tpu.dot_dimension_numbers<[1], [0], [0], [1], [0, 0, 1, 1], [], []>} : vector<8x128xbf16>, vector<128x8xbf16>, vector<8x8xf32> -> vector<8x8xf32>
    %c0_15 = arith.constant 0 : index
    %c0_16 = arith.constant 0 : index
    %22 = vector.load %arg7[%c0_15, %c0_16] : memref<1x8xf32, #tpu.memory_space<vmem>>, vector<1x8xf32>
    %23 = vector.broadcast %22 : vector<1x8xf32> to vector<8x8xf32>
    %24 = arith.addf %21, %23 : vector<8x8xf32>
    %c0_17 = arith.constant 0 : index
    %c0_18 = arith.constant 0 : index
    %25 = vector.load %arg10[%c0_17, %c0_18] : memref<8x8xf32, #tpu.memory_space<vmem>>, vector<8x8xf32>
    tpu.vector_store %arg10[%c0_17, %c0_18], %24 {strides = array<i32>} : memref<8x8xf32, #tpu.memory_space<vmem>>, vector<8x8xf32>,
    %c0_19 = arith.constant 0 : index
    %c0_20 = arith.constant 0 : index
    %26 = vector.load %arg8[%c0_19, %c0_20] : memref<128x8xbf16, #tpu.memory_space<vmem>>, vector<128x8xbf16>
    %cst_21 = arith.constant dense<0.000000e+00> : vector<8x8xf32>
    %27 = tpu.matmul %19, %26, %cst_21 {dimension_numbers = #tpu.dot_dimension_numbers<[1], [0], [0], [1], [0, 0, 1, 1], [], []>} : vector<8x128xbf16>, vector<128x8xbf16>, vector<8x8xf32> -> vector<8x8xf32>
    %c0_22 = arith.constant 0 : index
    %c0_23 = arith.constant 0 : index
    %28 = vector.load %arg9[%c0_22, %c0_23] : memref<1x8xf32, #tpu.memory_space<vmem>>, vector<1x8xf32>
    %29 = vector.broadcast %28 : vector<1x8xf32> to vector<8x8xf32>
    %30 = arith.addf %27, %29 : vector<8x8xf32>
    %c0_24 = arith.constant 0 : index
    %c0_25 = arith.constant 0 : index
    %31 = vector.load %arg11[%c0_24, %c0_25] : memref<8x8xf32, #tpu.memory_space<vmem>>, vector<8x8xf32>
    tpu.vector_store %arg11[%c0_24, %c0_25], %30 {strides = array<i32>} : memref<8x8xf32, #tpu.memory_space<vmem>>, vector<8x8xf32>,
    return
  }
  func.func @transform_0(%arg0: i32) -> (i32, i32) {
    %c0_i32 = arith.constant 0 : i32
    %c0_i32_0 = arith.constant 0 : i32
    return %arg0, %c0_i32 : i32, i32
  }
  func.func @transform_1(%arg0: i32) -> (i32, i32) {
    %c0_i32 = arith.constant 0 : i32
    %c0_i32_0 = arith.constant 0 : i32
    %c0_i32_1 = arith.constant 0 : i32
    return %c0_i32, %c0_i32_0 : i32, i32
  }
  func.func @transform_2(%arg0: i32) -> (i32, i32) {
    %c0_i32 = arith.constant 0 : i32
    %c0_i32_0 = arith.constant 0 : i32
    %c0_i32_1 = arith.constant 0 : i32
    return %c0_i32, %c0_i32_0 : i32, i32
  }
  func.func @transform_3(%arg0: i32) -> (i32, i32) {
    %c0_i32 = arith.constant 0 : i32
    %c0_i32_0 = arith.constant 0 : i32
    %c0_i32_1 = arith.constant 0 : i32
    return %c0_i32, %c0_i32_0 : i32, i32
  }
  func.func @transform_4(%arg0: i32) -> (i32, i32) {
    %c0_i32 = arith.constant 0 : i32
    %c0_i32_0 = arith.constant 0 : i32
    %c0_i32_1 = arith.constant 0 : i32
    return %c0_i32, %c0_i32_0 : i32, i32
  }
  func.func @transform_5(%arg0: i32) -> (i32, i32) {
    %c0_i32 = arith.constant 0 : i32
    %c0_i32_0 = arith.constant 0 : i32
    %c0_i32_1 = arith.constant 0 : i32
    return %c0_i32, %c0_i32_0 : i32, i32
  }
  func.func @transform_6(%arg0: i32) -> (i32, i32) {
    %c0_i32 = arith.constant 0 : i32
    %c0_i32_0 = arith.constant 0 : i32
    %c0_i32_1 = arith.constant 0 : i32
    return %c0_i32, %c0_i32_0 : i32, i32
  }
  func.func @transform_7(%arg0: i32) -> (i32, i32) {
    %c0_i32 = arith.constant 0 : i32
    %c0_i32_0 = arith.constant 0 : i32
    %c0_i32_1 = arith.constant 0 : i32
    return %c0_i32, %c0_i32_0 : i32, i32
  }
  func.func @transform_8(%arg0: i32) -> (i32, i32) {
    %c0_i32 = arith.constant 0 : i32
    %c0_i32_0 = arith.constant 0 : i32
    %c0_i32_1 = arith.constant 0 : i32
    return %c0_i32, %c0_i32_0 : i32, i32
  }
  func.func @transform_9(%arg0: i32) -> (i32, i32) {
    %c0_i32 = arith.constant 0 : i32
    %c0_i32_0 = arith.constant 0 : i32
    return %arg0, %c0_i32 : i32, i32
  }
  func.func @transform_10(%arg0: i32) -> (i32, i32) {
    %c0_i32 = arith.constant 0 : i32
    %c0_i32_0 = arith.constant 0 : i32
    return %arg0, %c0_i32 : i32, i32
  }
}

</mosaic_0001>

<bundles_post_ra>
// kernel: tpu_custom_call.1
= control target key start
LH: loop header
LB: loop body
LE: loop exit
PB: predicated region body
PF: predicated region fallthrough
CT: control target
= control target key end

     0   :  { %16 = vsyncpa [#allocation3], 0  ;;  %vm51_vm0 = vcmask 130048   ;;  %s689_s0 = inlined_call_operand.vmem [shape: f32[8,16], index: 0, kind: input, shape index: {}]   ;;  %s690_s1 = inlined_call_operand.vmem [shape: bf16[16,128], index: 1, kind: input, shape index: {}]   ;;  %s691_s2 = inlined_call_operand.vmem [shape: f32[1,128], index: 2, kind: input, shape index: {}]   ;;  %s692_s3 = inlined_call_operand.vmem [shape: bf16[128,128], index: 3, kind: input, shape index: {}]   ;;  %s693_s4 = inlined_call_operand.vmem [shape: f32[1,128], index: 4, kind: input, shape index: {}]   ;;  %s694_s5 = inlined_call_operand.vmem [shape: bf16[128,8], index: 5, kind: input, shape index: {}]   ;;  %s695_s6 = inlined_call_operand.vmem [shape: f32[1,8], index: 6, kind: input, shape index: {}]   ;;  %s696_s7 = inlined_call_operand.vmem [shape: bf16[128,8], index: 7, kind: input, shape index: {}]   ;;  %s697_s8 = inlined_call_operand.vmem [shape: f32[1,8], index: 8, kind: input, shape index: {}]   ;;  %s698_s9 = inlined_call_operand.hbm [shape: f32[8,8], index: 9, kind: output, shape index: {0}]   ;;  %s699_s10 = inlined_call_operand.hbm [shape: f32[8,8], index: 10, kind: output, shape index: {1}]  }
   0x1   :  { %v453_v0 = vld [vmem:[%s690_s1] sm:$0xff]  ;;  %v461_v2 = vld [vmem:[%s692_s3 + $0x38] sm:$0xff]  ;;  %v460_v4 = vld [vmem:[%s692_s3 + $0x30] sm:$0xff] }
   0x2   :  { %v37_v1 = vld [vmem:[%s689_s0] sm:$0xff]  ;;  %62 = vmatpush.bf16.msra.mxu0 %v453_v0  ;;  %139 = vmatpush.bf16.msra.mxu1 %v461_v2 }
   0x3   :  { %v38_v3 = vpack.c.bf16 %v37_v1, %v37_v1 }
   0x4   :  { %17 = vsyncpa [#allocation5], 0  ;;  %v459_v5 = vld [vmem:[%s692_s3 + $0x28] sm:$0xff]  ;;  %v458_v6 = vld [vmem:[%s692_s3 + $0x20] sm:$0xff]  ;;  %s536_s22 = smov [#allocation4]   ;;  %s338_s25 = sshll.u32 %s699_s10, 4  ;;  %s339_s25 = int_to_ptr.hbm [resolvable:$true] %s338_s25 }
   0x5   :  { %356 = vmatmul.msk.bf16.vlgmr.msra.gmra.mxu0 %vm51_vm0, %v38_v3  ;;  %v457_v7 = vld [vmem:[%s692_s3 + $0x18] sm:$0xff]  ;;  %v456_v8 = vld [vmem:[%s692_s3 + $0x10] sm:$0xff]  ;;  %v455_v9 = vld [vmem:[%s692_s3 + $0x8] sm:$0xff]  ;;  %s336_s23 = sshll.u32 %s536_s22, 4  ;;  %s537_s26 = smov [#allocation2]   ;;  %vm236_vm1 = vcmask 64512   ;;  %s337_s23 = int_to_ptr.vmem [resolvable:$true] %s336_s23 }
   0x6   :  { %140 = vmatpush.bf16.msra.mxu1 %v460_v4  ;;  %v454_v10 = vld [vmem:[%s692_s3] sm:$0xff]  ;;  %v469_v11 = vld [vmem:[%s694_s5 + $0x38] sm:$0xff]  ;;  %v468_v13 = vld [vmem:[%s694_s5 + $0x30] sm:$0xff]  ;;  %s325_s27 = sshll.u32 %s537_s26, 4  ;;  %s327_s30 = sshll.u32 %s698_s9, 4  ;;  %s326_s27 = int_to_ptr.vmem [resolvable:$true] %s325_s27  ;;  %s328_s30 = int_to_ptr.hbm [resolvable:$true] %s327_s30 }
   0x7   :  { %v477_v12 = vld [vmem:[%s696_s7 + $0x38] sm:$0xff]  ;;  %223 = vmatpush.bf16.msra.mxu2 %v469_v11  ;;  %v476_v14 = vld [vmem:[%s696_s7 + $0x30] sm:$0xff]  ;;  %v467_v15 = vld [vmem:[%s694_s5 + $0x28] sm:$0xff] }
   0x8   :  { %306 = vmatpush.bf16.msra.mxu3 %v477_v12  ;;  %v475_v16 = vld [vmem:[%s696_s7 + $0x28] sm:$0xff]  ;;  %v466_v17 = vld [vmem:[%s694_s5 + $0x20] sm:$0xff]  ;;  %v465_v19 = vld [vmem:[%s694_s5 + $0x18] sm:$0xff] }
   0x9   :  { %v474_v18 = vld [vmem:[%s696_s7 + $0x20] sm:$0xff]  ;;  %v473_v20 = vld [vmem:[%s696_s7 + $0x18] sm:$0xff]  ;;  %v464_v21 = vld [vmem:[%s694_s5 + $0x10] sm:$0xff] }
   0xa   :  { %141 = vmatpush.bf16.msra.mxu1 %v459_v5  ;;  %v472_v22 = vld [vmem:[%s696_s7 + $0x10] sm:$0xff]  ;;  %v480_v23 = vld [vmem:[%s691_s2] ss:$0 sm:$0xff]  ;;  %v463_v30 = vld [vmem:[%s694_s5 + $0x8] sm:$0xff] }
   0xb   :  { %224 = vmatpush.bf16.msra.mxu2 %v468_v13  ;;  %v471_v31 = vld [vmem:[%s696_s7 + $0x8] sm:$0xff]  ;;  %v462_v32 = vld [vmem:[%s694_s5] sm:$0xff] }
   0xc   :  { %307 = vmatpush.bf16.msra.mxu3 %v476_v14  ;;  %v470_v33 = vld [vmem:[%s696_s7] sm:$0xff] }
   0xd   :  { %v481_v34 = vld [vmem:[%s693_s4] ss:$0 sm:$0xff] }
   0xe   :  { %142 = vmatpush.bf16.msra.mxu1 %v458_v6  ;;  %v482_v41 = vld [vmem:[%s695_s6] ss:$0 sm:$0xff] }
   0xf   :  { %225 = vmatpush.bf16.msra.mxu2 %v467_v15  ;;  %v483_v42 = vld [vmem:[%s697_s8] ss:$0 sm:$0xff] }
  0x10   :  { %308 = vmatpush.bf16.msra.mxu3 %v475_v16 }
  0x12   :  { %143 = vmatpush.bf16.msra.mxu1 %v457_v7 }
  0x13   :  { %226 = vmatpush.bf16.msra.mxu2 %v466_v17 }
  0x14   :  { %309 = vmatpush.bf16.msra.mxu3 %v474_v18 }
  0x16   :  { %144 = vmatpush.bf16.msra.mxu1 %v456_v8 }
  0x17   :  { %227 = vmatpush.bf16.msra.mxu2 %v465_v19 }
  0x18   :  { %310 = vmatpush.bf16.msra.mxu3 %v473_v20 }
  0x1a   :  { %145 = vmatpush.bf16.msra.mxu1 %v455_v9 }
  0x1b   :  { %228 = vmatpush.bf16.msra.mxu2 %v464_v21 }
  0x1c   :  { %311 = vmatpush.bf16.msra.mxu3 %v472_v22 }
  0x1e   :  { %146 = vmatpush.bf16.msra.mxu1 %v454_v10 }
  0x1f   :  { %229 = vmatpush.bf16.msra.mxu2 %v463_v30 }
  0x20   :  { %312 = vmatpush.bf16.msra.mxu3 %v471_v31 }
  0x23   :  { %230 = vmatpush.bf16.msra.mxu2 %v462_v32 }
  0x24   :  { %313 = vmatpush.bf16.msra.mxu3 %v470_v33 }
  0x82   :  { %v64_v24 = vpop.f32.mrf.mxu0 }
  0x83   :  { %v65_v25 = vadd.f32 %v480_v23, %v64_v24 }
  0x85   :  { %v68_v26 = vmul.f32 0.2, %v65_v25 }
  0x87   :  { %v69_v27 = vmax.f32 %v65_v25, %v68_v26 }
  0x89   :  { %v70_v28 = vpack.c.bf16 %v69_v27, %v69_v27 }
  0x8a   :  { %v66_v29 = vpop.f32.mrf.mxu0 }
  0x8b   :  { %147 = vmatmul.bf16.vlgmr.msra.gmra.mxu1 %v70_v28 }
 0x108   :  { %v148_v35 = vpop.f32.mrf.mxu1 }
 0x109   :  { %v149_v36 = vadd.f32 %v481_v34, %v148_v35 }
 0x10b   :  { %v152_v37 = vmul.f32 0.2, %v149_v36 }
 0x10d   :  { %v153_v38 = vmax.f32 %v149_v36, %v152_v37 }
 0x10f   :  { %v154_v39 = vpack.c.bf16 %v153_v38, %v153_v38 }
 0x110   :  { %v150_v40 = vpop.f32.mrf.mxu1 }
 0x111   :  { %231 = vmatmul.bf16.vlgmr.msra.gmra.mxu2 %v154_v39  ;;  %314 = vmatmul.bf16.vlgmr.msra.gmra.mxu3 %v154_v39 }
 0x194   :  { %v232_v43 = vpop.f32.mrf.mxu2  ;;  %v315_v44 = vpop.f32.mrf.mxu3 }
 0x195   :  { %v233_v45 = vadd.f32 %v482_v41, %v232_v43  ;;  %v316_v46 = vadd.f32 %v483_v42, %v315_v44 }
 0x197   :  { %319 = vst.msk [vmem:[#allocation4] sm:$0xff] %vm236_vm1, %v316_v46 }
 0x198   :  { %237 = vst.msk [vmem:[#allocation2] sm:$0xff] %vm236_vm1, %v233_v45  ;;  %341 = dma.vmem_to_hbm [thread:$0]  %s337_s23, 128, %s339_s25, [#allocation5]  }
 0x199   :  { %330 = dma.vmem_to_hbm [thread:$0]  %s326_s27, 128, %s328_s30, [#allocation3]  }
 0x19c   :  { %v234_v47 = vpop.f32.mrf.mxu2  ;;  %v317_v48 = vpop.f32.mrf.mxu3 }
 0x19d   :  { %532 = dma.done.wait [#allocation3], 128  }
 0x19e   :  { %533 = vsyncadd [#allocation3], 4294967168 }
 0x19f   :  { %534 = dma.done.wait [#allocation5], 128  }
 0x1a0   :  { %535 = vsyncadd [#allocation5], 4294967168 }
 0x1a1   :  { %350 = vsyncpa [#allocation3], 1 }
 0x1a2   :  { %351 = vsyncpa [#allocation5], 1 }

</bundles_post_ra>
